<compile_context>
chip_gen: v7x
topology: tpu7x:2x2x1
jax: 0.10.0
libtpu: 0.0.40
codegen_flags: <defaults>
</compile_context>

<pallas_src>
import math

import jax
import jax.numpy as jnp
from jax.experimental import pallas as pl
from jax.experimental.pallas import tpu as pltpu


def _pick_tile(n, candidates):
    """Largest candidate <= n that divides n; fall back to n (single block)."""
    for c in candidates:
        if c <= n and n % c == 0:
            return c
    return n


def xw_kernel(x_ref, w_ref, o_ref):
    # xw_tile = x_tile @ W_padded   (bf16 operands, f32 MXU accumulation)
    o_ref[...] = jnp.dot(
        x_ref[...], w_ref[...], preferred_element_type=jnp.float32
    ).astype(o_ref.dtype)


def adj_matmul_kernel(adj_ref, xw_ref, b_ref, o_ref, acc_ref):
    # out_tile = (sum_k adj[i, k] @ xw[k]) + b
    # adj_ref: (tm, tk) bf16, xw_ref: (tk, outDim_p) bf16,
    # b_ref: (1, outDim_p) f32, o_ref: (tm, outDim_p) f32, acc_ref: VMEM f32.
    k = pl.program_id(1)

    @pl.when(k == 0)
    def _():
        acc_ref[...] = jnp.zeros_like(acc_ref)

    acc_ref[...] += jnp.dot(
        adj_ref[...], xw_ref[...], preferred_element_type=jnp.float32
    )

    @pl.when(k == pl.num_programs(1) - 1)
    def _():
        o_ref[...] = (acc_ref[...] + b_ref[...]).astype(o_ref.dtype)


def gcn_conv_layer(adj, x, W, b, *, tm=256, tk=512):
    """out = adj @ x @ W + b, computed as adj @ (x @ W) + b."""
    N, inDim = x.shape
    outDim = W.shape[1]
    assert adj.shape == (N, N)

    # Lane-dense padded output width (multiple of 128) -> unmasked stores.
    outDim_p = ((outDim + 127) // 128) * 128
    W_p = jnp.zeros((inDim, outDim_p), jnp.float32).at[:, :outDim].set(
        W.astype(jnp.float32)
    )
    b_p = jnp.zeros((1, outDim_p), jnp.float32).at[0, :outDim].set(
        b.astype(jnp.float32)
    )

    # bf16 MXU operands (f32 accumulation inside the kernels).
    x_bf = x.astype(jnp.bfloat16)
    w_bf = W_p.astype(jnp.bfloat16)
    adj_bf = adj.astype(jnp.bfloat16)

    # Tile sizes: large enough to fill the MXU, clamped to divisors of N so no
    # partial block ever lands on the contraction axis.
    tm_eff = _pick_tile(N, (tm, 256, 128, 64, 32, 16, 8))
    tk_eff = _pick_tile(N, (tk, 512, 256, 128))

    # --- Prologue: xw = x @ W_p  (cheap one-time matmul, row-tiled) ---------
    xw = pl.pallas_call(
        xw_kernel,
        out_shape=jax.ShapeDtypeStruct((N, outDim_p), jnp.bfloat16),
        grid_spec=pltpu.PrefetchScalarGridSpec(
            num_scalar_prefetch=0,
            grid=(pl.cdiv(N, tm_eff),),
            in_specs=[
                pl.BlockSpec((tm_eff, inDim), lambda i: (i, 0)),
                pl.BlockSpec((inDim, outDim_p), lambda i: (0, 0)),
            ],
            out_specs=pl.BlockSpec((tm_eff, outDim_p), lambda i: (i, 0)),
        ),
        compiler_params=pltpu.CompilerParams(
            dimension_semantics=("parallel",)
        ),
    )(x_bf, w_bf)

    # --- Main: out = adj @ xw + b  (rows parallel, contraction K-tiled) -----
    out_p = pl.pallas_call(
        adj_matmul_kernel,
        out_shape=jax.ShapeDtypeStruct((N, outDim_p), x.dtype),
        grid_spec=pltpu.PrefetchScalarGridSpec(
            num_scalar_prefetch=0,
            grid=(pl.cdiv(N, tm_eff), pl.cdiv(N, tk_eff)),
            in_specs=[
                pl.BlockSpec((tm_eff, tk_eff), lambda i, k: (i, k)),      # adj tile
                pl.BlockSpec((tk_eff, outDim_p), lambda i, k: (k, 0)),    # xw strip
                pl.BlockSpec((1, outDim_p), lambda i, k: (0, 0)),         # bias
            ],
            out_specs=pl.BlockSpec((tm_eff, outDim_p), lambda i, k: (i, 0)),
            scratch_shapes=[pltpu.VMEM((tm_eff, outDim_p), jnp.float32)],
        ),
        compiler_params=pltpu.CompilerParams(
            dimension_semantics=("parallel", "arbitrary"),
        ),
    )(adj_bf, xw, b_p)

    return out_p[:, :outDim]


if __name__ == "__main__":
    # Small, module-consistent shapes.
    N = 64        # number of graph nodes
    inDim = 32
    outDim = 16

    key = jax.random.PRNGKey(0)
    k_x, k_adj, k_w = jax.random.split(key, 3)

    # Deterministic parameter init matching setParam():
    # W ~ U(-r, r), r = sqrt(6/(In+Out)); b = 0.
    abs_range = math.sqrt(6.0 / (inDim + outDim))
    W = jax.random.uniform(
        k_w, (inDim, outDim), dtype=jnp.float32, minval=-abs_range, maxval=abs_range
    )
    b = jnp.zeros((outDim,), dtype=jnp.float32)

    # Inputs: node features and a (dense representation of a) sparse adjacency.
    x = jax.random.normal(k_x, (N, inDim), dtype=jnp.float32)
    adj_dense = jax.random.uniform(k_adj, (N, N), dtype=jnp.float32)
    adj = jnp.where(adj_dense > 0.8, adj_dense, 0.0)  # ~20% nonzeros

    out = gcn_conv_layer(adj, x, W, b)
    out = jax.block_until_ready(out)

    # Reference (plain f32 JAX). bf16 MXU operands -> allow small relative error.
    ref = adj @ x @ W + b
    assert out.shape == (N, outDim)
    rel_err = jnp.linalg.norm(out - ref) / (jnp.linalg.norm(ref) + 1e-12)
    assert float(rel_err) < 2e-2, f"relative error too large: {float(rel_err)}"

    print("KERNEL_OK")
</pallas_src>

<mosaic_0001>
module attributes {stable_mosaic.version = 11 : i64} {
  func.func @xw_kernel(%arg0: i32, %arg1: memref<64x32xbf16, #tpu.memory_space<vmem>>, %arg2: memref<32x128xbf16, #tpu.memory_space<vmem>>, %arg3: memref<64x128xbf16, #tpu.memory_space<vmem>>) attributes {dimension_semantics = [#tpu.dimension_semantics<parallel>], iteration_bounds = array<i64: 1>, scalar_prefetch = 0 : i64, scratch_operands = 0 : i64, tpu.core_type = #tpu.core_type<tc>, window_params = [{transform_indices = @transform_0, window_bounds = array<i64: 64, 32>}, {pipeline_mode = #tpu.pipeline_mode<synchronous>, transform_indices = @transform_1, window_bounds = array<i64: 32, 128>}, {transform_indices = @transform_2, window_bounds = array<i64: 64, 128>}]} {
    %c0 = arith.constant 0 : index
    %c0_0 = arith.constant 0 : index
    %0 = vector.load %arg1[%c0, %c0_0] : memref<64x32xbf16, #tpu.memory_space<vmem>>, vector<64x32xbf16>
    %c0_1 = arith.constant 0 : index
    %c0_2 = arith.constant 0 : index
    %1 = vector.load %arg2[%c0_1, %c0_2] : memref<32x128xbf16, #tpu.memory_space<vmem>>, vector<32x128xbf16>
    %cst = arith.constant dense<0.000000e+00> : vector<64x128xf32>
    %2 = tpu.matmul %0, %1, %cst {dimension_numbers = #tpu.dot_dimension_numbers<[1], [0], [0], [1], [0, 0, 1, 1], [], []>} : vector<64x32xbf16>, vector<32x128xbf16>, vector<64x128xf32> -> vector<64x128xf32>
    %3 = arith.truncf %2 : vector<64x128xf32> to vector<64x128xbf16>
    %c0_3 = arith.constant 0 : index
    %c0_4 = arith.constant 0 : index
    %4 = vector.load %arg3[%c0_3, %c0_4] : memref<64x128xbf16, #tpu.memory_space<vmem>>, vector<64x128xbf16>
    tpu.vector_store %arg3[%c0_3, %c0_4], %3 {strides = array<i32>} : memref<64x128xbf16, #tpu.memory_space<vmem>>, vector<64x128xbf16>,
    return
  }
  func.func @transform_0(%arg0: i32) -> (i32, i32) {
    %c0_i32 = arith.constant 0 : i32
    %c0_i32_0 = arith.constant 0 : i32
    return %arg0, %c0_i32 : i32, i32
  }
  func.func @transform_1(%arg0: i32) -> (i32, i32) {
    %c0_i32 = arith.constant 0 : i32
    %c0_i32_0 = arith.constant 0 : i32
    %c0_i32_1 = arith.constant 0 : i32
    return %c0_i32, %c0_i32_0 : i32, i32
  }
  func.func @transform_2(%arg0: i32) -> (i32, i32) {
    %c0_i32 = arith.constant 0 : i32
    %c0_i32_0 = arith.constant 0 : i32
    return %arg0, %c0_i32 : i32, i32
  }
}

</mosaic_0001>

<bundles_post_ra>
// kernel: tpu_custom_call.1
= control target key start
LH: loop header
LB: loop body
LE: loop exit
PB: predicated region body
PF: predicated region fallthrough
CT: control target
= control target key end

     0   :  { %vm57_vm0 = vcmask 261120   ;;  %s343_s0 = inlined_call_operand.vmem [shape: bf16[64,32], index: 0, kind: input, shape index: {}]   ;;  %s344_s1 = inlined_call_operand.vmem [shape: bf16[32,128], index: 1, kind: input, shape index: {}]   ;;  %s345_s2 = inlined_call_operand.hbm [shape: bf16[64,128], index: 2, kind: output, shape index: {}]  }
   0x1   :  { %v265_v0 = vld [vmem:[%s344_s1] sm:$0xff]   ;;  %v266_v1 = vld [vmem:[%s344_s1 + $0x8] sm:$0xff]   ;;  %v268_v3 = vld [vmem:[%s343_s0 + $0x10] sm:$0xff]  }
   0x2   :  { %246 = vmatprep.subr.bf16.mxu0 %v265_v0  ;;  %258 = vmatprep.subr.bf16.mxu1 %v265_v0  ;;  %v267_v2 = vld [vmem:[%s343_s0] sm:$0xff]   ;;  %v269_v4 = vld [vmem:[%s343_s0 + $0x8] sm:$0xff]   ;;  %v270_v5 = vld [vmem:[%s343_s0 + $0x18] sm:$0xff]  }
   0x3   :  { %247 = vmatpush3.bf16.msra.mxu0 %v265_v0  ;;  %260 = vmatpush3.bf16.msra.mxu1 %v265_v0 }
   0x4   :  { %248 = vmatprep.subr.bf16.mxu0 %v266_v1  ;;  %259 = vmatprep.subr.bf16.mxu1 %v266_v1 }
   0x5   :  { %250 = vmatprep.mubr.msk.bf16.mxu0 %vm57_vm0, %v267_v2  ;;  %254 = vmatprep.mubr.msk.bf16.mxu1 %vm57_vm0, %v268_v3 }
   0x6   :  { %7 = vsyncpa [#allocation3], 0  ;;  %s295_s20 = smov [#allocation2]  }
   0x7   :  { %249 = vmatpush3.bf16.msra.mxu0 %v266_v1  ;;  %261 = vmatpush3.bf16.msra.mxu1 %v266_v1  ;;  %s180_s21 = sshll.u32 %s295_s20, 4  ;;  %s181_s21 = int_to_ptr.vmem [resolvable:$true] %s180_s21 }
   0x8   :  { %s271_s0 = scalar_lea.vmem %s181_s21, 512  ;;  %p276_p1 = scmp.lt.s32.totalorder %s181_s21, %s181_s21 }
   0x9   :  { %p272_p0 = scmp.ne.s32.totalorder %s181_s21, %s271_s0  ;;  %p277_p2 = scmp.lt.s32.totalorder %s271_s0, %s271_s0 }
   0xa   :  { %251 = vmatmul.mubr.msk.bf16.vlgmr.msra.gmra.mrb[0].mxu0 %vm57_vm0, %v269_v4  ;;  %255 = vmatmul.mubr.msk.bf16.vlgmr.msra.gmra.mrb[0].mxu1 %vm57_vm0, %v270_v5 }
   0xb   :  { %p278_p3 = por %p277_p2, %p276_p1 }
   0xd   :  { %p279_p4 = pnand %p278_p3, %p272_p0 }
  0xdd   :  { %v252_v6 = vpop.f32.mrb[0].mxu0  ;;  %v256_v7 = vpop.f32.mrb[0].mxu1 }
  0xde   :  { %v104_v8 = vpop.f32.mrb[1].mxu0  ;;  %v120_v9 = vpop.f32.mrb[1].mxu1 }
  0xdf   :  { %v253_v10 = vpop.f32.mrb[2].mxu0  ;;  %v257_v11 = vpop.f32.mrb[2].mxu1 }
  0xe0   :  { %v225_v12 = vpack.c.bf16 %v253_v10, %v252_v6  ;;  %v235_v13 = vpack.c.bf16 %v257_v11, %v256_v7  ;;  %v107_v14 = vpop.f32.mrb[3].mxu0  ;;  %v123_v15 = vpop.f32.mrb[3].mxu1 }
  0xe1   :  { %v220_v16 = vpack.c.bf16 %v107_v14, %v104_v8  ;;  %v230_v17 = vpack.c.bf16 %v123_v15, %v120_v9 }
  0xe2   :  { %237 = vst [vmem:[#allocation2 + $0x8] sm:$0xff] %v225_v12   ;;  %239 = vst [vmem:[#allocation2 + $0x18] sm:$0xff] %v235_v13  }
  0xe3   :  { %221 = vst [vmem:[#allocation2] sm:$0xff] %v220_v16   ;;  %238 = vst [vmem:[#allocation2 + $0x10] sm:$0xff] %v230_v17  }
  0xe4   :  { %282 = shalt.err (!%p279_p4)
}
  0xe5   :  { %s283_s24 = scalar_lea.hbm %s345_s2, 512 }
  0xe6   :  { %p284_p5 = scmp.ne.s32.totalorder %s345_s2, %s283_s24  ;;  %p287_p6 = scmp.lt.u32.totalorder %s283_s24, %s345_s2 }
  0xe8   :  { %p289_p7 = pnand %p287_p6, %p284_p5 }
  0xea   :  { %292 = shalt.err (!%p289_p7)
}
  0xeb   :  { %s296_s29 = smov 64   ;;  %s297_s30 = smov 4  }
  0xec   :  { %186 = dma.vmem_to_hbm [thread:$0]  %s181_s21, 512, %s345_s2, [#allocation3], %s296_s29, %s296_s29, %s297_s30  }
  0xed   :  { %293 = dma.done.wait [#allocation3], 512  }
  0xee   :  { %294 = vsyncadd [#allocation3], 4294966784 }
  0xef   :  { %190 = vsyncpa [#allocation3], 1 }

</bundles_post_ra>
